<compile_context>
chip_gen: v6e
topology: v6e:2x2x1
jax: 0.10.0
libtpu: 0.0.40
codegen_flags: <defaults>
</compile_context>

<pallas_src>
import functools

import jax
import jax.numpy as jnp
from jax.experimental import pallas as pl
from jax.experimental.pallas import tpu as pltpu


def _pick_tile(size, candidates):
    """Largest candidate tile that evenly divides `size`, else the full extent."""
    for c in candidates:
        if size % c == 0:
            return c
    return size


# --------------------- Stage 1: QKV projection (x @ W_qkv) ---------------------

def qkv_proj_kernel(x_ref, w_ref, qkv_ref):
    # x_ref: (TM, dim) bf16, w_ref: (1, dim, inner) bf16, qkv_ref: (1, TM, inner) bf16
    qkv_ref[0] = jnp.dot(
        x_ref[...], w_ref[0], preferred_element_type=jnp.float32
    ).astype(qkv_ref.dtype)


def _qkv_projection(x2_bf, w3_bf):
    rows, dim = x2_bf.shape
    _, _, inner = w3_bf.shape
    tm = _pick_tile(rows, (512, 256, 128))
    return pl.pallas_call(
        qkv_proj_kernel,
        out_shape=jax.ShapeDtypeStruct((3, rows, inner), jnp.bfloat16),
        grid=(3, rows // tm),  # chunk axis slow -> each weight chunk DMA'd once
        in_specs=[
            pl.BlockSpec((tm, dim), lambda c, i: (i, 0)),         # x row tile
            pl.BlockSpec((1, dim, inner), lambda c, i: (c, 0, 0)),  # W chunk (q/k/v)
        ],
        out_specs=pl.BlockSpec((1, tm, inner), lambda c, i: (c, i, 0)),
        compiler_params=pltpu.CompilerParams(
            dimension_semantics=("parallel", "parallel"),
            vmem_limit_bytes=48 * 1024 * 1024,  # sized under v7x's 64 MiB VMEM
        ),
    )(x2_bf, w3_bf)


# ------------- Stage 2: per (batch, query-tile) attention + out proj -----------

def attn_out_kernel(q_ref, k_ref, v_ref, wo_ref, bo_ref, o_ref, *,
                    heads, dim_head, scale):
    tq = q_ref.shape[2]
    n = k_ref.shape[2]
    inner = heads * dim_head

    # Fold the module's `* scale` into q once (cheaper than scaling the scores).
    q = (q_ref[0, 0].astype(jnp.float32) * scale).astype(jnp.bfloat16)  # (TQ, inner)
    k = k_ref[0, 0]                                                     # (n,  inner) bf16
    v = v_ref[0, 0]                                                     # (n,  inner) bf16

    # 'n (h d) -> h n d' head-major layout for batched MXU matmuls.
    qh = jnp.swapaxes(q.reshape(tq, heads, dim_head), 0, 1)   # (h, TQ, d)
    kh = jnp.swapaxes(k.reshape(n, heads, dim_head), 0, 1)    # (h, n,  d)
    vh = jnp.swapaxes(v.reshape(n, heads, dim_head), 0, 1)    # (h, n,  d)

    # Scores + softmax statistics in f32 (v5e has no bf16 VPU/EUP).
    dots = jnp.einsum('hqd,hkd->hqk', qh, kh,
                      preferred_element_type=jnp.float32)     # (h, TQ, n)
    m = jnp.max(dots, axis=-1, keepdims=True)
    p = jnp.exp(dots - m)
    l = jnp.sum(p, axis=-1, keepdims=True)                    # (h, TQ, 1)

    # Unnormalized probs @ V (bf16 in, f32 acc); normalize the small (h,TQ,d)
    # result with an EUP reciprocal instead of dividing the (h,TQ,n) probs.
    ctx = jnp.einsum('hqk,hkd->hqd', p.astype(jnp.bfloat16), vh,
                     preferred_element_type=jnp.float32)
    ctx = ctx * pl.reciprocal(l, approx=True)                 # (h, TQ, d) f32

    # 'h q d -> q (h d)' lane-dense slab, then output projection + bias.
    out_inner = jnp.swapaxes(ctx, 0, 1).reshape(tq, inner).astype(jnp.bfloat16)
    o = jnp.dot(out_inner, wo_ref[...], preferred_element_type=jnp.float32)
    o_ref[0] = (o + bo_ref[...]).astype(o_ref.dtype)


def attention_forward(x, w_qkv, w_out, b_out, *, heads, dim_head, scale):
    b, n, dim = x.shape
    inner = heads * dim_head
    assert w_qkv.shape == (dim, 3 * inner)
    assert w_out.shape == (inner, dim)

    # One-time dtype / layout plumbing (weights + activations to bf16 for the MXU).
    x2_bf = x.reshape(b * n, dim).astype(jnp.bfloat16)
    w3_bf = jnp.swapaxes(w_qkv.reshape(dim, 3, inner), 0, 1).astype(jnp.bfloat16)
    wo_bf = w_out.astype(jnp.bfloat16)
    bo = b_out.reshape(1, dim).astype(jnp.float32)

    # Stage 1: qkv stored chunk-major (3, b, n, inner) in bf16 (half the HBM traffic).
    qkv = _qkv_projection(x2_bf, w3_bf).reshape(3, b, n, inner)

    # Stage 2: attention + output projection, tiled over (batch, query tiles).
    tq = _pick_tile(n, (256, 128))
    kernel = functools.partial(attn_out_kernel, heads=heads,
                               dim_head=dim_head, scale=scale)
    return pl.pallas_call(
        kernel,
        out_shape=jax.ShapeDtypeStruct((b, n, dim), x.dtype),
        grid=(b, n // tq),
        in_specs=[
            pl.BlockSpec((1, 1, tq, inner), lambda bi, qi: (0, bi, qi, 0)),  # q tile
            pl.BlockSpec((1, 1, n, inner), lambda bi, qi: (1, bi, 0, 0)),    # k (full seq)
            pl.BlockSpec((1, 1, n, inner), lambda bi, qi: (2, bi, 0, 0)),    # v (full seq)
            pl.BlockSpec((inner, dim), lambda bi, qi: (0, 0)),               # W_out (resident)
            pl.BlockSpec((1, dim), lambda bi, qi: (0, 0)),                   # b_out (resident)
        ],
        out_specs=pl.BlockSpec((1, tq, dim), lambda bi, qi: (bi, qi, 0)),
        compiler_params=pltpu.CompilerParams(
            dimension_semantics=("parallel", "parallel"),
            vmem_limit_bytes=48 * 1024 * 1024,
        ),
    )(qkv, qkv, qkv, wo_bf, bo)


# --------------------------------- reference -----------------------------------

def attention_reference(x, w_qkv, w_out, b_out, *, heads, dim_head, scale):
    b, n, dim = x.shape
    inner = heads * dim_head
    qkv = x @ w_qkv
    q, k, v = jnp.split(qkv, 3, axis=-1)

    def split_heads(t):  # 'b n (h d) -> b h n d'
        return t.reshape(b, n, heads, dim_head).transpose(0, 2, 1, 3)

    q, k, v = map(split_heads, (q, k, v))
    dots = jnp.einsum('bhqd,bhkd->bhqk', q, k) * scale
    attn = jax.nn.softmax(dots, axis=-1)
    out = jnp.einsum('bhqk,bhkd->bhqd', attn, v)
    out = out.transpose(0, 2, 1, 3).reshape(b, n, inner)  # 'b h n d -> b n (h d)'
    return out @ w_out + b_out


if __name__ == "__main__":
    # Small shapes consistent with the module.
    batch, seq, dim = 2, 8, 32
    heads, dim_head = 4, 16
    inner_dim = heads * dim_head
    scale = dim ** (-0.5)   # module uses dim, not dim_head

    key = jax.random.PRNGKey(0)
    kx, kq, ko, kb = jax.random.split(key, 4)
    x = jax.random.normal(kx, (batch, seq, dim), dtype=jnp.float32)
    # Deterministic parameter init (Linear weights stored as (in, out) for x @ W).
    w_qkv = jax.random.normal(kq, (dim, inner_dim * 3), dtype=jnp.float32) * (dim ** -0.5)
    w_out = jax.random.normal(ko, (inner_dim, dim), dtype=jnp.float32) * (inner_dim ** -0.5)
    b_out = jax.random.normal(kb, (dim,), dtype=jnp.float32) * 0.02  # Linear bias (default True)

    out = attention_forward(x, w_qkv, w_out, b_out,
                            heads=heads, dim_head=dim_head, scale=scale)
    out = jax.block_until_ready(out)

    ref = attention_reference(x, w_qkv, w_out, b_out,
                              heads=heads, dim_head=dim_head, scale=scale)
    assert out.shape == (batch, seq, dim)
    # bf16 MXU inputs with f32 accumulation -> looser tolerance vs the f32 reference.
    assert jnp.allclose(out, ref, atol=5e-2, rtol=5e-2), "mismatch vs reference"

    print("KERNEL_OK")
</pallas_src>

<mosaic_0001>
module attributes {stable_mosaic.version = 11 : i64} {
  func.func @qkv_proj_kernel(%arg0: i32, %arg1: i32, %arg2: memref<16x32xbf16, #tpu.memory_space<vmem>>, %arg3: memref<1x32x64xbf16, #tpu.memory_space<vmem>>, %arg4: memref<1x16x64xbf16, #tpu.memory_space<vmem>>) attributes {dimension_semantics = [#tpu.dimension_semantics<parallel>, #tpu.dimension_semantics<parallel>], iteration_bounds = array<i64: 3, 1>, scalar_prefetch = 0 : i64, scratch_operands = 0 : i64, tpu.core_type = #tpu.core_type<tc>, window_params = [{transform_indices = @transform_0, window_bounds = array<i64: 16, 32>}, {transform_indices = @transform_1, window_bounds = array<i64: 1, 32, 64>}, {transform_indices = @transform_2, window_bounds = array<i64: 1, 16, 64>}]} {
    %c0 = arith.constant 0 : index
    %c0_0 = arith.constant 0 : index
    %0 = vector.load %arg2[%c0, %c0_0] : memref<16x32xbf16, #tpu.memory_space<vmem>>, vector<16x32xbf16>
    %c0_1 = arith.constant 0 : index
    %c0_2 = arith.constant 0 : index
    %c0_3 = arith.constant 0 : index
    %1 = vector.load %arg3[%c0_1, %c0_2, %c0_3] : memref<1x32x64xbf16, #tpu.memory_space<vmem>>, vector<1x32x64xbf16>
    %2 = vector.shape_cast %1 : vector<1x32x64xbf16> to vector<32x64xbf16>
    %cst = arith.constant dense<0.000000e+00> : vector<16x64xf32>
    %3 = tpu.matmul %0, %2, %cst {dimension_numbers = #tpu.dot_dimension_numbers<[1], [0], [0], [1], [0, 0, 1, 1], [], []>} : vector<16x32xbf16>, vector<32x64xbf16>, vector<16x64xf32> -> vector<16x64xf32>
    %4 = arith.truncf %3 : vector<16x64xf32> to vector<16x64xbf16>
    %c0_4 = arith.constant 0 : index
    %c0_5 = arith.constant 0 : index
    %c0_6 = arith.constant 0 : index
    %5 = vector.load %arg4[%c0_4, %c0_5, %c0_6] : memref<1x16x64xbf16, #tpu.memory_space<vmem>>, vector<1x16x64xbf16>
    %6 = vector.shape_cast %5 : vector<1x16x64xbf16> to vector<16x64xbf16>
    %7 = vector.shape_cast %4 : vector<16x64xbf16> to vector<1x16x64xbf16>
    tpu.vector_store %arg4[%c0_4, %c0_5, %c0_6], %7 {strides = array<i32>} : memref<1x16x64xbf16, #tpu.memory_space<vmem>>, vector<1x16x64xbf16>,
    return
  }
  func.func @transform_0(%arg0: i32, %arg1: i32) -> (i32, i32) {
    %c0_i32 = arith.constant 0 : i32
    %c0_i32_0 = arith.constant 0 : i32
    return %arg1, %c0_i32 : i32, i32
  }
  func.func @transform_1(%arg0: i32, %arg1: i32) -> (i32, i32, i32) {
    %c0_i32 = arith.constant 0 : i32
    %c0_i32_0 = arith.constant 0 : i32
    %c0_i32_1 = arith.constant 0 : i32
    return %arg0, %c0_i32, %c0_i32_0 : i32, i32, i32
  }
  func.func @transform_2(%arg0: i32, %arg1: i32) -> (i32, i32, i32) {
    %c0_i32 = arith.constant 0 : i32
    %c0_i32_0 = arith.constant 0 : i32
    return %arg0, %arg1, %c0_i32 : i32, i32, i32
  }
}

</mosaic_0001>

<bundles_post_ra>
// kernel: tpu_custom_call.1
= control target key start
LH: loop header
LB: loop body
LE: loop exit
PB: predicated region body
PF: predicated region fallthrough
CT: control target
= control target key end

     0   :  { %7 = vsyncpa [#allocation3], 0  ;;  %s865_s0 = inlined_call_operand.hbm [shape: bf16[16,32], index: 0, kind: input, shape index: {}]   ;;  %s866_s1 = inlined_call_operand.hbm [shape: bf16[3,32,64], index: 1, kind: input, shape index: {}]   ;;  %s867_s2 = inlined_call_operand.hbm [shape: bf16[3,16,64], index: 2, kind: output, shape index: {}]  }
   0x1   :  { %8 = vsyncpa [#allocation6], 0 }
   0x2   :  { %10 = vsyncpa [#allocation6 + $0x1], 0 }
   0x3   :  { %11 = vsyncpa [#allocation4], 0 }
   0x4   :  { %13 = vsyncpa [#allocation4 + $0x1], 0  ;;  %s679_s9 = smov 0   ;;  %s681_s10 = smov 0  }
   0x5   :  { %s683_s11 = smov 0   ;;  %s685_s12 = smov 0  }
   0x6   :  { %s687_s13 = smov 0   ;;  %s689_s14 = smov 0  }
   0x7 LB: > { %s395_s15 = sadd.s32 4294967295, %s653_s14   ;;  %s396_s16 = sadd.s32 4294967294, %s653_s14   ;;  %s653_s14 = sphi %s689_s14, %s19_s14   ;;  %s649_s13 = sphi %s687_s13, %s886_s13   ;;  %s645_s12 = sphi %s685_s12, %s885_s12   ;;  %s641_s11 = sphi %s683_s11, %s884_s11   ;;  %s637_s10 = sphi %s681_s10, %s883_s10   ;;  %s633_s9 = sphi %s679_s9, %s882_s9  }
   0x8   : > { %p77_p0 = scmp.ne.s32.totalorder %s637_s10, %s633_s9  ;;  %p713_p1 = scmp.eq.s32.totalorder %s395_s15, 0 }
   0x9   : > { %p717_p2 = scmp.eq.s32.totalorder %s395_s15, 2  ;;  %p109_p3 = scmp.eq.s32.totalorder %s396_s16, 2 }
   0xa   : > { %p723_p4 = por %p713_p1, %p77_p0  ;;  %p397_p5 = scmp.ge.s32.totalorder %s653_s14, 1 }
   0xb   : > { %p728_p6 = por %p109_p3, %p77_p0  ;;  %p116_p7 = scmp.lt.s32.totalorder %s653_s14, 4 }
   0xc   : > { %s655_s22 = smov [#allocation2]   ;;  %s31_s25 = sadd.s32 1, %s649_s13 }
   0xd   : > { %s873_s20 = scalar_select %p728_p6, 1, 0 }
   0xe   : > { %p733_p8 = pnand %p397_p5, %p116_p7  ;;  %s131_s23 = sshll.u32 %s655_s22, 4  ;;  %s132_s23 = int_to_ptr.vmem [resolvable:$true] %s131_s23 }
   0xf   : > { %s526_s26 = scalar_lea.vmem %s132_s23, 128  ;;  %p534_p3 = scmp.lt.s32.totalorder %s132_s23, %s132_s23 }
  0x10   : > { %p441_p9 = pneg %p733_p8  ;;  %p527_p12 = scmp.ne.s32.totalorder %s132_s23, %s526_s26 }
  0x11   : > { %p535_p5 = scmp.lt.s32.totalorder %s526_s26, %s526_s26 }
  0x12   : > { %p741_p10 = pnand %p441_p9, %p713_p1 }
  0x13   : > { %p536_p7 = por %p535_p5, %p534_p3 }
  0x14   : > { %p517_p11 = pneg %p741_p10 }
  0x16   : > { %p529_p13 = pnand %p527_p12, %p517_p11 }
  0x18   : > { %p530_p0 = pneg %p529_p13 }
  0x1a   : > { %p537_p6 = pnand %p536_p7, %p530_p0 }
  0x1c   : > { %540 = shalt.err (!%p537_p6)
}
  0x1d   : > { %s868_s27 = smov 64   ;;  %s657_s28 = smov 4  }
  0x1e   : > { %444 = dma.hbm_to_vmem [thread:$0]  (!%p741_p10), %s865_s0, 128, %s132_s23, [#allocation3], %s868_s27, %s868_s27, %s657_s28  }
  0x1f   : > { %p33_p6 = scmp.ge.s32.totalorder %s31_s25, 3  ;;  %s64_s3 = sadd.s32 1, %s641_s11 }
  0x20   : > { %p71_p9 = scmp.ne.s32.totalorder %s641_s11, %s637_s10  ;;  %p72_p11 = scmp.eq.s32.totalorder %s653_s14, 0 }
  0x21   : > { %s888_s25 = smov (%p33_p6, %s31_s25), 0  ;;  %p454_p0 = scmp.lt.s32.totalorder %s653_s14, 3 }
  0x22   : > { %p762_p12 = por %p72_p11, %p71_p9  ;;  %p768_p13 = por %p717_p2, %p71_p9 }
  0x23   : > { %s61_s6 = ssub.s32 %s649_s13, %s888_s25  ;;  %s145_s7 = sand.u32 1, %s641_s11  }
  0x24   : > { %s877_s5 = scalar_select %p768_p13, 1, 0 }
  0x25   : > { %p62_p10 = scmp.eq.s32.totalorder %s61_s6, 0  ;;  %s400_s8 = sshll.u32 %s145_s7, 4 }
  0x26   : > { %s418_s16 = sshll.u32 %s649_s13, 8  ;;  %s149_s26 = scalar_lea.vmem [#allocation5], %s400_s8 }
  0x27   : > { %s777_s15 = scalar_select %p62_p10, %s641_s11, %s64_s3  }
  0x28   : > { %s155_s24 = scalar_lea.hbm %s866_s1, %s418_s16  ;;  %s156_s29 = sshll.u32 %s149_s26, 4  ;;  %s157_s29 = int_to_ptr.vmem [resolvable:$true] %s156_s29 }
  0x29   : > { %p785_p2 = pnand %p454_p0, %p762_p12  ;;  %s146_s30 = scalar_lea.sflag [#allocation6], %s145_s7 }
  0x2a   : > { %s554_s6 = scalar_lea.vmem %s157_s29, 256  ;;  %s658_s3 = smov [#allocation5]  }
  0x2b   : > { %p543_p3 = pneg %p785_p2  ;;  %p555_p5 = scmp.ne.s32.totalorder %s157_s29, %s554_s6 }
  0x2c   : > { %s559_s27 = sshll.u32 %s658_s3, 4  ;;  %s560_s27 = int_to_ptr.vmem [resolvable:$false] %s559_s27 }
  0x2d   : > { %p557_p7 = pnand %p555_p5, %p543_p3  ;;  %s561_s16 = scalar_lea.vmem %s560_s27, 512 }
  0x2e   : > { %p562_p9 = scmp.lt.s32.totalorder %s157_s29, %s560_s27  ;;  %p563_p11 = scmp.lt.s32.totalorder %s561_s16, %s554_s6 }
  0x2f   : > { %p558_p6 = pneg %p557_p7 }
  0x30   : > { %p564_p10 = por %p563_p11, %p562_p9 }
  0x32   : > { %p565_p13 = pnand %p564_p10, %p558_p6 }
  0x34   : > { %568 = shalt.err (!%p565_p13)
}
  0x35   : > { %s879_s4 = smov 64   ;;  %168 = sbr.rel (%p733_p8) target bundleno = 285 (0x11d), region = 28 }
  0x36   : > { %448 = dma.hbm_to_vmem [thread:$0]  (!%p785_p2), %s155_s24, 256, %s157_s29, %s146_s30, %s879_s4, %s879_s4, %s657_s28  }
  0x3a   : > { %620 = dma.done.wait (%p713_p1), [#allocation3], 128  }
  0x3b   : > { %622 = vsyncadd (%p713_p1), [#allocation3], 4294967168  ;;  %s803_s27 = sand.u32 1, %s637_s10  }
  0x3c   : > { %s405_s7 = sshll.u32 %s803_s27, 4  ;;  %s175_s8 = scalar_lea.sflag [#allocation6], %s803_s27 }
  0x3d   : > { %s178_s22 = scalar_lea.vmem [#allocation5], %s405_s7 }
  0x3e   : > { %624 = dma.done.wait (%p723_p4), %s175_s8, 256  }
  0x3f   : > { %626 = vsyncadd (%p723_p4), %s175_s8, 4294967040  ;;  %v659_v0 = vmov 0.0   ;;  %vm660_vm0 = vmmov 0   ;;  %v512_v1 = vld [vmem:[%s178_s22 + $0x8] sm:$0xff]   ;;  %v513_v2 = vld [vmem:[%s178_s22] sm:$0xff]   ;;  %vm225_vm1 = vcmask 261120  }
  0x40   : > { %425 = vmatprep.subr.bf16.mxu0 %v659_v0  ;;  %429 = vmatprep.mubr.msk.bf16.mxu0 %vm660_vm0, %v659_v0  ;;  %v514_v3 = vld [vmem:[#allocation2] sm:$0xff]   ;;  %s406_s17 = sshll.u32 %s803_s27, 3  ;;  %vm278_vm2 = vcmask 519168   ;;  %s421_s28 = sshll.u32 %s645_s12, 7 }
  0x41   : > { %426 = vmatpush3.bf16.msra.mxu0 %v512_v1  ;;  %s198_s19 = scalar_lea.vmem [#allocation7], %s406_s17  ;;  %s818_s26 = scalar_lea.hbm %s867_s2, %s421_s28 }
  0x42   : > { %427 = vmatprep.subr.bf16.mxu0 %v659_v0  ;;  %s297_s21 = sshll.u32 %s198_s19, 4  ;;  %s282_s29 = scalar_lea.sflag [#allocation4], %s803_s27  ;;  %s813_s21 = int_to_ptr.vmem [resolvable:$true] %s297_s21 }
  0x43   : > { %s569_s18 = scalar_lea.vmem %s813_s21, 128  ;;  %p880_p4 = scmp.ne.s32.totalorder %s877_s5, 0 }
  0x44   : > { %p570_p1 = scmp.ne.s32.totalorder %s813_s21, %s569_s18  ;;  %s661_s12 = smov [#allocation7]  }
  0x45   : > { %428 = vmatpush3.bf16.msra.mxu0 %v513_v2  ;;  %s573_s30 = sshll.u32 %s661_s12, 4  ;;  %s574_s30 = int_to_ptr.vmem [resolvable:$false] %s573_s30 }
  0x46   : > { %p571_p8 = pnand %p570_p1, %p880_p4  ;;  %s575_s6 = scalar_lea.vmem %s574_s30, 256 }
  0x47   : > { %p576_p13 = scmp.lt.s32.totalorder %s813_s21, %s574_s30  ;;  %p577_p0 = scmp.lt.s32.totalorder %s575_s6, %s569_s18 }
  0x48   : > { %430 = vmatmul.mubr.msk.bf16.vlgmr.msra.gmra.mxu0 %vm225_vm1, %v514_v3  ;;  %p572_p12 = pneg %p571_p8 }
  0x49   : > { %p578_p2 = por %p577_p0, %p576_p13 }
  0x4b   : > { %p579_p3 = pnand %p578_p2, %p572_p12 }
 0x108   : > { %v263_v4 = vpop.f32.mrf.mxu0 }
 0x109   : > { %v419_v5 = vpack.c.bf16 %v263_v4, %v263_v4 }
 0x10a   : > { %v431_v6 = vpop.f32.mrf.mxu0 }
 0x10b   : > { %279 = vst.msk [vmem:[%s198_s19] sm:$0xf] %vm278_vm2, %v419_v5 }
 0x10c   : > { %v266_v7 = vpop.f32.mrf.mxu0 }
 0x10d   : > { %v420_v8 = vpack.c.bf16 %v266_v7, %v266_v7 }
 0x10e   : > { %v432_v9 = vpop.f32.mrf.mxu0 }
 0x10f   : > { %280 = vst.msk [vmem:[%s198_s19 + $0x4] sm:$0xf] %vm278_vm2, %v420_v8 }
 0x110   : > { %582 = shalt.err (!%p579_p3)
}
 0x111   : > { %s583_s3 = scalar_lea.hbm %s818_s26, 128  ;;  %s587_s7 = scalar_lea.hbm %s867_s2, 384 }
 0x112   : > { %p584_p5 = scmp.ne.s32.totalorder %s818_s26, %s583_s3  ;;  %p588_p9 = scmp.lt.s32.totalorder %s818_s26, %s867_s2 }
 0x113   : > { %p589_p11 = scmp.lt.s32.totalorder %s587_s7, %s583_s3 }
 0x114   : > { %p585_p7 = pnand %p584_p5, %p880_p4 }
 0x115   : > { %p590_p10 = por %p589_p11, %p588_p9 }
 0x116   : > { %p586_p6 = pneg %p585_p7 }
 0x118   : > { %p591_p1 = pnand %p590_p10, %p586_p6 }
 0x11a   : > { %594 = shalt.err (!%p591_p1)
}
 0x11b   : > { %s662_s17 = smov 64   ;;  %s663_s19 = smov 4  }
 0x11c   : > { %439 = dma.vmem_to_hbm [thread:$0]  (%p880_p4), %s813_s21, 128, %s818_s26, %s282_s29, %s662_s17, %s662_s17, %s663_s19  }
 0x11d PF: > { %p456_p8 = scmp.ge.s32.totalorder %s653_s14, 2  ;;  %s312_s28 = sand.u32 1, %s633_s9  }
 0x11e   : > { %p881_p12 = scmp.ne.s32.totalorder %s873_s20, 0  ;;  %s313_s23 = scalar_lea.sflag [#allocation4], %s312_s28 }
 0x120   : > { %p450_p13 = pnand %p456_p8, %p881_p12 }
 0x122   : > { %p451_p0 = pneg %p450_p13 }
 0x124   : > { %628 = dma.done.wait (%p451_p0), %s313_s23, 128  }
 0x125   : > { %630 = vsyncadd (%p451_p0), %s313_s23, 4294967168  ;;  %s19_s14 = sadd.s32 1, %s653_s14   ;;  %s882_s9 = smov %s637_s10 }
 0x126   : > { %p16_p2 = scmp.ge.s32.totalorder %s19_s14, 5   ;;  %s883_s10 = smov %s641_s11 }
 0x127   : > { %s884_s11 = smov %s777_s15  ;;  %s885_s12 = smov %s649_s13 }
 0x128   : > { %s886_s13 = smov %s888_s25  ;;  %18 = sbr.rel (!%p16_p2) target bundleno = 7 (0x7), region = 79 }
 0x12d   :  { %318 = vsyncpa [#allocation3], 1 }
 0x12e   :  { %320 = vsyncpa [#allocation3 + $0x1], 1 }
 0x12f   :  { %321 = vsyncpa [#allocation6], 1 }
 0x130   :  { %323 = vsyncpa [#allocation6 + $0x1], 1 }
 0x131   :  { %324 = vsyncpa [#allocation4], 1 }
 0x132   :  { %326 = vsyncpa [#allocation4 + $0x1], 1 }

</bundles_post_ra>
